<compile_context>
chip_gen: v7x
topology: tpu7x:2x2x1
jax: 0.10.0
libtpu: 0.0.40
codegen_flags: <defaults>
</compile_context>

<pallas_src>
import functools

import jax
import jax.numpy as jnp
from jax import lax
from jax.experimental import pallas as pl
from jax.experimental.pallas import tpu as pltpu


_GELU_C = 0.7978845608028654  # sqrt(2/pi)


def convblock_kernel(x_ref, wp_ref, bp_ref, w1_ref, b1_ref, w2_ref, b2_ref,
                     o_ref, *, K, DIL, PAD, L, BL, C_out,
                     STACK1, STACK2, GELU_F32, HAS_PROJ):
    x = x_ref[...]                                    # (C_in, BL) bf16

    # Sample-local lane position (B samples of length L laid contiguously).
    pos = lax.broadcasted_iota(jnp.int32, (1, BL), 1) % L

    # Per-tap (shift, mask).  Tap k reads input position t + off, off = k*DIL-PAD;
    # positions outside the sample are SamePadConv's implicit zero padding (the
    # mask also kills cross-sample wraparound from rolling over the B*L slab).
    taps = []
    for k in range(K):
        off = k * DIL - PAD
        if off == 0:
            taps.append((0, None))
        else:
            mask = jnp.logical_and(pos + off >= 0, pos + off < L)
            taps.append(((-off) % BL, mask))

    def gelu_bf16(v):
        # tanh-approx GELU (EUP); bf16 math on v6e/v7x, f32 on older gens.
        h = v.astype(jnp.float32) if GELU_F32 else v.astype(jnp.bfloat16)
        g = 0.5 * h * (1.0 + jnp.tanh(_GELU_C * (h + 0.044715 * (h * h * h))))
        return g.astype(jnp.bfloat16)                 # MXU operand dtype

    def conv(w, g, b, contraction_stack):
        # One SamePadConv on bf16 activation g -> f32 (C_out, BL).
        if contraction_stack:
            # Taps stacked on the contraction dim: roll+mask the small (C, BL)
            # bf16 activation, concatenate (tile-aligned since C % 16 == 0) and
            # let the MXU perform the K-tap sum in its accumulator.
            parts = []
            for shift, mask in taps:
                q = g
                if shift:
                    q = pltpu.roll(q, shift=shift, axis=1)      # XLU slot
                if mask is not None:
                    q = jnp.where(mask, q, jnp.zeros_like(q))
                parts.append(q)
            gs = parts[0] if len(parts) == 1 else jnp.concatenate(parts, axis=0)
            return jnp.dot(w, gs, preferred_element_type=jnp.float32) + b
        # Fallback for channel counts not 16-aligned: taps stacked on the output
        # dim (one matmul), then a K-way combine of aligned (C_out, BL) slices.
        p = jnp.dot(w, g, preferred_element_type=jnp.float32)
        acc = None
        for k, (shift, mask) in enumerate(taps):
            q = p[k * C_out:(k + 1) * C_out, :]
            if shift:
                q = pltpu.roll(q, shift=shift, axis=1)
            if mask is not None:
                q = jnp.where(mask, q, jnp.zeros_like(q))
            acc = q if acc is None else acc + q
        return acc + b

    h1 = conv(w1_ref[...], gelu_bf16(x), b1_ref[...], STACK1)    # conv1(gelu(x))
    h2 = conv(w2_ref[...], gelu_bf16(h1), b2_ref[...], STACK2)   # conv2(gelu(h1))

    # Residual computed last: shortens the live range of its (C_out, BL) tile.
    if HAS_PROJ:
        res = jnp.dot(wp_ref[...], x, preferred_element_type=jnp.float32) + bp_ref[...]
    else:
        res = x.astype(jnp.float32)

    # Lane-dense full-width store (BL is a multiple of 128 or full extent).
    o_ref[...] = (h2 + res).astype(o_ref.dtype)


def _pick_block_batch(N, L, lane_cap=2048):
    """Samples per grid step: lane width B*L a multiple of 128 (lane-dense,
    unmasked stores), as wide as the cap allows, and >=2 grid steps when
    possible so both v7x TensorCores get work."""
    candidates = [B for B in range(1, N + 1) if N % B == 0 and (B * L) % 128 == 0]
    if not candidates:
        return N                       # single full-extent block (always legal)
    good = [B for B in candidates if B * L <= lane_cap and N // B >= 2]
    if good:
        return max(good)
    within = [B for B in candidates if B * L <= lane_cap]
    return max(within) if within else min(candidates)


def _gelu_math_in_f32():
    """bf16 VPU/EUP exists on v6e/v7x; keep GELU math in f32 on older gens."""
    try:
        kind = jax.devices()[0].device_kind.lower()
    except Exception:
        return True
    return not any(t in kind for t in ("v6", "v7"))


def conv_block_lanes(x2d, params, *, N, L, kernel_size, dilation, block_batch=None):
    """ConvBlock forward on a lane-dense (C_in, N*L) bf16 activation slab.

    Returns (C_out, N*L) float32.  A stacked DilatedConvEncoder should keep its
    activations in this layout between blocks (transpose only at entry/exit)."""
    C_in = x2d.shape[0]
    K = kernel_size
    C_out = params["w1"].shape[1]
    receptive_field = (K - 1) * dilation + 1
    pad = receptive_field // 2

    B = _pick_block_batch(N, L) if block_batch is None else block_batch
    assert N % B == 0
    BL = B * L

    # Contraction-dim tap stacking needs the conv's input-channel count to be a
    # multiple of the bf16 sublane tile (16) so the in-kernel concat is aligned.
    stack1 = (C_in % 16 == 0)
    stack2 = (C_out % 16 == 0)

    def prep_w(w, contraction_stack):
        k, co, c = w.shape
        if contraction_stack:          # (C_out, K*C) : element [o, k*C + c]
            return jnp.transpose(w, (1, 0, 2)).reshape(co, k * c).astype(jnp.bfloat16)
        return w.reshape(k * co, c).astype(jnp.bfloat16)     # (K*C_out, C)

    w1s = prep_w(params["w1"], stack1)
    w2s = prep_w(params["w2"], stack2)

    has_proj = params.get("w_proj", None) is not None
    if has_proj:
        wp = params["w_proj"].astype(jnp.bfloat16)
        bp = params["b_proj"].astype(jnp.float32)
    else:
        assert C_in == C_out, "identity residual requires C_in == C_out"
        wp = jnp.zeros((1, 1), jnp.bfloat16)
        bp = jnp.zeros((1, 1), jnp.float32)

    kernel = functools.partial(
        convblock_kernel, K=K, DIL=dilation, PAD=pad, L=L, BL=BL, C_out=C_out,
        STACK1=stack1, STACK2=stack2, GELU_F32=_gelu_math_in_f32(),
        HAS_PROJ=has_proj)

    return pl.pallas_call(
        kernel,
        out_shape=jax.ShapeDtypeStruct((C_out, N * L), jnp.float32),
        grid_spec=pltpu.PrefetchScalarGridSpec(
            num_scalar_prefetch=0,
            grid=(N // B,),
            in_specs=[
                pl.BlockSpec((C_in, BL), lambda i: (0, i)),        # x slab
                pl.BlockSpec(wp.shape, lambda i: (0, 0)),          # projector w
                pl.BlockSpec(bp.shape, lambda i: (0, 0)),          # projector b
                pl.BlockSpec(w1s.shape, lambda i: (0, 0)),         # conv1 w
                pl.BlockSpec((C_out, 1), lambda i: (0, 0)),        # conv1 b
                pl.BlockSpec(w2s.shape, lambda i: (0, 0)),         # conv2 w
                pl.BlockSpec((C_out, 1), lambda i: (0, 0)),        # conv2 b
            ],
            out_specs=pl.BlockSpec((C_out, BL), lambda i: (0, i)),
        ),
        compiler_params=pltpu.CompilerParams(
            # TODO(synk): try pltpu.CORE_PARALLEL here on v7x (plain "parallel"
            # already keeps >=2 independent grid steps available).
            dimension_semantics=("parallel",),
            vmem_limit_bytes=32 * 1024 * 1024,
        ),
    )(x2d, wp, bp, w1s, params["b1"].astype(jnp.float32),
      w2s, params["b2"].astype(jnp.float32))


def conv_block(x, params, *, kernel_size, dilation, block_batch=None):
    """ConvBlock forward on (N, C_in, L); returns (N, C_out, L)."""
    N, C_in, L = x.shape
    C_out = params["w1"].shape[1]
    # Layout plumbing: channels -> sublanes, batch*time -> lanes (lane-dense).
    x2d = jnp.transpose(x, (1, 0, 2)).reshape(C_in, N * L).astype(jnp.bfloat16)
    o2d = conv_block_lanes(x2d, params, N=N, L=L, kernel_size=kernel_size,
                           dilation=dilation, block_batch=block_batch)
    return jnp.transpose(o2d.reshape(C_out, N, L), (1, 0, 2)).astype(x.dtype)


# ---------------- pure-JAX reference (for correctness check) ----------------
# Mirrors the kernel's numerics (bf16 matmul operands, f32 accumulation,
# tanh-approx GELU in the same precision); vs a pure-f32 torch forward the
# remaining deviation is at the bf16 / gelu-approximation level (~1e-2).
def convblock_ref(x, params, kernel_size, dilation, gelu_f32):
    bf16, f32 = jnp.bfloat16, jnp.float32
    K = kernel_size
    rf = (K - 1) * dilation + 1
    pad = rf // 2
    remove = 1 if rf % 2 == 0 else 0

    def gelu_bf16(v):
        h = v.astype(f32) if gelu_f32 else v.astype(bf16)
        g = 0.5 * h * (1.0 + jnp.tanh(_GELU_C * (h + 0.044715 * (h * h * h))))
        return g.astype(bf16)

    def conv1d(g, w, b):
        gp = jnp.pad(g, ((0, 0), (0, 0), (pad, pad)))
        L_out = g.shape[-1] + 2 * pad - (K - 1) * dilation
        acc = jnp.zeros((g.shape[0], w.shape[1], L_out), f32) + b[:, 0][None, :, None]
        for k in range(K):
            acc = acc + jnp.einsum("oc,ncl->nol", w[k].astype(bf16),
                                   gp[:, :, k * dilation:k * dilation + L_out],
                                   preferred_element_type=f32)
        return acc[:, :, :-remove] if remove else acc

    xb = x.astype(bf16)
    if params.get("w_proj", None) is not None:
        residual = (jnp.einsum("oc,ncl->nol", params["w_proj"].astype(bf16), xb,
                               preferred_element_type=f32)
                    + params["b_proj"][:, 0][None, :, None])
    else:
        residual = xb.astype(f32)
    h = conv1d(gelu_bf16(xb), params["w1"], params["b1"])
    h = conv1d(gelu_bf16(h), params["w2"], params["b2"])
    return h + residual


def _make_params(key, K, C_in, C_out):
    ks = jax.random.split(key, 6)
    return {
        "w1": 0.3 * jax.random.normal(ks[0], (K, C_out, C_in), jnp.float32),
        "b1": 0.1 * jax.random.normal(ks[1], (C_out, 1), jnp.float32),
        "w2": 0.3 * jax.random.normal(ks[2], (K, C_out, C_out), jnp.float32),
        "b2": 0.1 * jax.random.normal(ks[3], (C_out, 1), jnp.float32),
        "w_proj": 0.3 * jax.random.normal(ks[4], (C_out, C_in), jnp.float32),
        "b_proj": 0.1 * jax.random.normal(ks[5], (C_out, 1), jnp.float32),
    }


if __name__ == "__main__":
    # TODO(synk): SpectralMaxNorm (spec_norm=True) is a training-time weight
    # parametrization; it is inactive for the default spec_norm=False and is
    # not translated here.
    key = jax.random.PRNGKey(0)
    gelu_f32 = _gelu_math_in_f32()

    # Config 1: tiny channels (not 16-aligned) -> output-dim tap-stacking path,
    #           odd receptive field (K=3, dilation=2).  C_in != C_out -> projector.
    # Config 2: 16-aligned channels -> contraction-dim tap-stacking path,
    #           even receptive field (K=2) exercising the 'remove last' branch.
    configs = [
        dict(N=8, C_in=4,  C_out=8,  L=64, K=3, dilation=2),
        dict(N=8, C_in=16, C_out=32, L=64, K=2, dilation=1),
    ]
    for i, cfg in enumerate(configs):
        kx, kp, key = jax.random.split(key, 3)
        x = jax.random.normal(kx, (cfg["N"], cfg["C_in"], cfg["L"]), jnp.float32)
        params = _make_params(kp, cfg["K"], cfg["C_in"], cfg["C_out"])

        out = jax.block_until_ready(
            conv_block(x, params, kernel_size=cfg["K"], dilation=cfg["dilation"]))
        ref = convblock_ref(x, params, cfg["K"], cfg["dilation"], gelu_f32)

        assert out.shape == (cfg["N"], cfg["C_out"], cfg["L"])
        assert jnp.allclose(out, ref, atol=2e-2, rtol=2e-2), f"mismatch (config {i})"

    print("KERNEL_OK")
</pallas_src>

<mosaic_0001>
module attributes {stable_mosaic.version = 11 : i64} {
  func.func @convblock_kernel(%arg0: i32, %arg1: memref<4x256xbf16, #tpu.memory_space<vmem>>, %arg2: memref<8x4xbf16, #tpu.memory_space<vmem>>, %arg3: memref<8x1xf32, #tpu.memory_space<vmem>>, %arg4: memref<24x4xbf16, #tpu.memory_space<vmem>>, %arg5: memref<8x1xf32, #tpu.memory_space<vmem>>, %arg6: memref<24x8xbf16, #tpu.memory_space<vmem>>, %arg7: memref<8x1xf32, #tpu.memory_space<vmem>>, %arg8: memref<8x256xf32, #tpu.memory_space<vmem>>) attributes {dimension_semantics = [#tpu.dimension_semantics<parallel>], iteration_bounds = array<i64: 2>, scalar_prefetch = 0 : i64, scratch_operands = 0 : i64, tpu.core_type = #tpu.core_type<tc>, window_params = [{transform_indices = @transform_0, window_bounds = array<i64: 4, 256>}, {pipeline_mode = #tpu.pipeline_mode<synchronous>, transform_indices = @transform_1, window_bounds = array<i64: 8, 4>}, {pipeline_mode = #tpu.pipeline_mode<synchronous>, transform_indices = @transform_2, window_bounds = array<i64: 8, 1>}, {pipeline_mode = #tpu.pipeline_mode<synchronous>, transform_indices = @transform_3, window_bounds = array<i64: 24, 4>}, {pipeline_mode = #tpu.pipeline_mode<synchronous>, transform_indices = @transform_4, window_bounds = array<i64: 8, 1>}, {pipeline_mode = #tpu.pipeline_mode<synchronous>, transform_indices = @transform_5, window_bounds = array<i64: 24, 8>}, {pipeline_mode = #tpu.pipeline_mode<synchronous>, transform_indices = @transform_6, window_bounds = array<i64: 8, 1>}, {transform_indices = @transform_7, window_bounds = array<i64: 8, 256>}]} {
    %c0 = arith.constant 0 : index
    %c0_0 = arith.constant 0 : index
    %0 = vector.load %arg1[%c0, %c0_0] : memref<4x256xbf16, #tpu.memory_space<vmem>>, vector<4x256xbf16>
    %1 = tpu.iota {dimensions = array<i32: 1>} : vector<1x256xi32>
    %c64_i32 = arith.constant 64 : i32
    %c0_i32 = arith.constant 0 : i32
    %2 = arith.cmpi eq, %c64_i32, %c0_i32 : i32
    %c1_i32 = arith.constant 1 : i32
    %3 = arith.select %2, %c1_i32, %c64_i32 : i32
    %4 = vector.broadcast %3 : i32 to vector<1x256xi32>
    %5 = arith.remsi %1, %4 : vector<1x256xi32>
    %c0_i32_1 = arith.constant 0 : i32
    %6 = vector.broadcast %c0_i32_1 : i32 to vector<1x256xi32>
    %7 = arith.cmpi ne, %5, %6 : vector<1x256xi32>
    %c0_i32_2 = arith.constant 0 : i32
    %8 = vector.broadcast %c0_i32_2 : i32 to vector<1x256xi32>
    %9 = arith.cmpi slt, %5, %8 : vector<1x256xi32>
    %c0_i32_3 = arith.constant 0 : i32
    %10 = arith.cmpi slt, %3, %c0_i32_3 : i32
    %11 = vector.broadcast %10 : i1 to vector<1x256xi1>
    %12 = vector.broadcast %11 : vector<1x256xi1> to vector<1x256xi1>
    %13 = arith.xori %9, %12 : vector<1x256xi1>
    %14 = arith.andi %13, %7 : vector<1x256xi1>
    %15 = vector.broadcast %3 : i32 to vector<1x256xi32>
    %16 = arith.addi %5, %15 : vector<1x256xi32>
    %17 = arith.select %14, %16, %5 : vector<1x256xi1>, vector<1x256xi32>
    %c-2_i32 = arith.constant -2 : i32
    %18 = vector.broadcast %c-2_i32 : i32 to vector<1x256xi32>
    %19 = arith.addi %17, %18 : vector<1x256xi32>
    %c0_i32_4 = arith.constant 0 : i32
    %20 = vector.broadcast %c0_i32_4 : i32 to vector<1x256xi32>
    %21 = arith.cmpi sge, %19, %20 : vector<1x256xi32>
    %c-2_i32_5 = arith.constant -2 : i32
    %22 = vector.broadcast %c-2_i32_5 : i32 to vector<1x256xi32>
    %23 = arith.addi %17, %22 : vector<1x256xi32>
    %c64_i32_6 = arith.constant 64 : i32
    %24 = vector.broadcast %c64_i32_6 : i32 to vector<1x256xi32>
    %25 = arith.cmpi slt, %23, %24 : vector<1x256xi32>
    %26 = arith.andi %21, %25 : vector<1x256xi1>
    %c2_i32 = arith.constant 2 : i32
    %27 = vector.broadcast %c2_i32 : i32 to vector<1x256xi32>
    %28 = arith.addi %17, %27 : vector<1x256xi32>
    %c0_i32_7 = arith.constant 0 : i32
    %29 = vector.broadcast %c0_i32_7 : i32 to vector<1x256xi32>
    %30 = arith.cmpi sge, %28, %29 : vector<1x256xi32>
    %c2_i32_8 = arith.constant 2 : i32
    %31 = vector.broadcast %c2_i32_8 : i32 to vector<1x256xi32>
    %32 = arith.addi %17, %31 : vector<1x256xi32>
    %c64_i32_9 = arith.constant 64 : i32
    %33 = vector.broadcast %c64_i32_9 : i32 to vector<1x256xi32>
    %34 = arith.cmpi slt, %32, %33 : vector<1x256xi32>
    %35 = arith.andi %30, %34 : vector<1x256xi1>
    %c0_10 = arith.constant 0 : index
    %c0_11 = arith.constant 0 : index
    %36 = vector.load %arg4[%c0_10, %c0_11] : memref<24x4xbf16, #tpu.memory_space<vmem>>, vector<24x4xbf16>
    %37 = arith.extf %0 : vector<4x256xbf16> to vector<4x256xf32>
    %cst = arith.constant 5.000000e-01 : f32
    %38 = vector.broadcast %cst : f32 to vector<4x256xf32>
    %39 = arith.mulf %38, %37 : vector<4x256xf32>
    %40 = arith.mulf %37, %37 : vector<4x256xf32>
    %41 = arith.mulf %40, %37 : vector<4x256xf32>
    %cst_12 = arith.constant 4.471500e-02 : f32
    %42 = vector.broadcast %cst_12 : f32 to vector<4x256xf32>
    %43 = arith.mulf %42, %41 : vector<4x256xf32>
    %44 = arith.addf %37, %43 : vector<4x256xf32>
    %cst_13 = arith.constant 0.797884583 : f32
    %45 = vector.broadcast %cst_13 : f32 to vector<4x256xf32>
    %46 = arith.mulf %45, %44 : vector<4x256xf32>
    %47 = math.tanh %46 : vector<4x256xf32>
    %cst_14 = arith.constant 1.000000e+00 : f32
    %48 = vector.broadcast %cst_14 : f32 to vector<4x256xf32>
    %49 = arith.addf %48, %47 : vector<4x256xf32>
    %50 = arith.mulf %39, %49 : vector<4x256xf32>
    %51 = arith.truncf %50 : vector<4x256xf32> to vector<4x256xbf16>
    %c0_15 = arith.constant 0 : index
    %c0_16 = arith.constant 0 : index
    %52 = vector.load %arg5[%c0_15, %c0_16] : memref<8x1xf32, #tpu.memory_space<vmem>>, vector<8x1xf32>
    %cst_17 = arith.constant dense<0.000000e+00> : vector<24x256xf32>
    %53 = tpu.matmul %36, %51, %cst_17 {dimension_numbers = #tpu.dot_dimension_numbers<[1], [0], [0], [1], [0, 0, 1, 1], [], []>} : vector<24x4xbf16>, vector<4x256xbf16>, vector<24x256xf32> -> vector<24x256xf32>
    %54 = vector.extract_strided_slice %53 {offsets = [0, 0], sizes = [8, 256], strides = [1, 1]} : vector<24x256xf32> to vector<8x256xf32>
    %c2_i32_18 = arith.constant 2 : i32
    %55 = tpu.dynamic_rotate %54 by %c2_i32_18 dim 1 : vector<8x256xf32>, i32 -> vector<8x256xf32>
    %cst_19 = arith.constant 0.000000e+00 : f32
    %56 = vector.broadcast %cst_19 : f32 to vector<8x256xf32>
    %57 = vector.shape_cast %26 : vector<1x256xi1> to vector<1x256xi1>
    %58 = vector.broadcast %57 : vector<1x256xi1> to vector<8x256xi1>
    %59 = arith.select %58, %55, %56 : vector<8x256xi1>, vector<8x256xf32>
    %60 = vector.extract_strided_slice %53 {offsets = [8, 0], sizes = [8, 256], strides = [1, 1]} : vector<24x256xf32> to vector<8x256xf32>
    %61 = arith.addf %59, %60 : vector<8x256xf32>
    %62 = vector.extract_strided_slice %53 {offsets = [16, 0], sizes = [8, 256], strides = [1, 1]} : vector<24x256xf32> to vector<8x256xf32>
    %c254_i32 = arith.constant 254 : i32
    %63 = tpu.dynamic_rotate %62 by %c254_i32 dim 1 : vector<8x256xf32>, i32 -> vector<8x256xf32>
    %cst_20 = arith.constant 0.000000e+00 : f32
    %64 = vector.broadcast %cst_20 : f32 to vector<8x256xf32>
    %65 = vector.shape_cast %35 : vector<1x256xi1> to vector<1x256xi1>
    %66 = vector.broadcast %65 : vector<1x256xi1> to vector<8x256xi1>
    %67 = arith.select %66, %63, %64 : vector<8x256xi1>, vector<8x256xf32>
    %68 = arith.addf %61, %67 : vector<8x256xf32>
    %69 = vector.broadcast %52 : vector<8x1xf32> to vector<8x256xf32>
    %70 = arith.addf %68, %69 : vector<8x256xf32>
    %c0_21 = arith.constant 0 : index
    %c0_22 = arith.constant 0 : index
    %71 = vector.load %arg6[%c0_21, %c0_22] : memref<24x8xbf16, #tpu.memory_space<vmem>>, vector<24x8xbf16>
    %cst_23 = arith.constant 5.000000e-01 : f32
    %72 = vector.broadcast %cst_23 : f32 to vector<8x256xf32>
    %73 = arith.mulf %72, %70 : vector<8x256xf32>
    %74 = arith.mulf %70, %70 : vector<8x256xf32>
    %75 = arith.mulf %74, %70 : vector<8x256xf32>
    %cst_24 = arith.constant 4.471500e-02 : f32
    %76 = vector.broadcast %cst_24 : f32 to vector<8x256xf32>
    %77 = arith.mulf %76, %75 : vector<8x256xf32>
    %78 = arith.addf %70, %77 : vector<8x256xf32>
    %cst_25 = arith.constant 0.797884583 : f32
    %79 = vector.broadcast %cst_25 : f32 to vector<8x256xf32>
    %80 = arith.mulf %79, %78 : vector<8x256xf32>
    %81 = math.tanh %80 : vector<8x256xf32>
    %cst_26 = arith.constant 1.000000e+00 : f32
    %82 = vector.broadcast %cst_26 : f32 to vector<8x256xf32>
    %83 = arith.addf %82, %81 : vector<8x256xf32>
    %84 = arith.mulf %73, %83 : vector<8x256xf32>
    %85 = arith.truncf %84 : vector<8x256xf32> to vector<8x256xbf16>
    %c0_27 = arith.constant 0 : index
    %c0_28 = arith.constant 0 : index
    %86 = vector.load %arg7[%c0_27, %c0_28] : memref<8x1xf32, #tpu.memory_space<vmem>>, vector<8x1xf32>
    %cst_29 = arith.constant dense<0.000000e+00> : vector<24x256xf32>
    %87 = tpu.matmul %71, %85, %cst_29 {dimension_numbers = #tpu.dot_dimension_numbers<[1], [0], [0], [1], [0, 0, 1, 1], [], []>} : vector<24x8xbf16>, vector<8x256xbf16>, vector<24x256xf32> -> vector<24x256xf32>
    %88 = vector.extract_strided_slice %87 {offsets = [0, 0], sizes = [8, 256], strides = [1, 1]} : vector<24x256xf32> to vector<8x256xf32>
    %c2_i32_30 = arith.constant 2 : i32
    %89 = tpu.dynamic_rotate %88 by %c2_i32_30 dim 1 : vector<8x256xf32>, i32 -> vector<8x256xf32>
    %cst_31 = arith.constant 0.000000e+00 : f32
    %90 = vector.broadcast %cst_31 : f32 to vector<8x256xf32>
    %91 = vector.shape_cast %26 : vector<1x256xi1> to vector<1x256xi1>
    %92 = vector.broadcast %91 : vector<1x256xi1> to vector<8x256xi1>
    %93 = arith.select %92, %89, %90 : vector<8x256xi1>, vector<8x256xf32>
    %94 = vector.extract_strided_slice %87 {offsets = [8, 0], sizes = [8, 256], strides = [1, 1]} : vector<24x256xf32> to vector<8x256xf32>
    %95 = arith.addf %93, %94 : vector<8x256xf32>
    %96 = vector.extract_strided_slice %87 {offsets = [16, 0], sizes = [8, 256], strides = [1, 1]} : vector<24x256xf32> to vector<8x256xf32>
    %c254_i32_32 = arith.constant 254 : i32
    %97 = tpu.dynamic_rotate %96 by %c254_i32_32 dim 1 : vector<8x256xf32>, i32 -> vector<8x256xf32>
    %cst_33 = arith.constant 0.000000e+00 : f32
    %98 = vector.broadcast %cst_33 : f32 to vector<8x256xf32>
    %99 = vector.shape_cast %35 : vector<1x256xi1> to vector<1x256xi1>
    %100 = vector.broadcast %99 : vector<1x256xi1> to vector<8x256xi1>
    %101 = arith.select %100, %97, %98 : vector<8x256xi1>, vector<8x256xf32>
    %102 = arith.addf %95, %101 : vector<8x256xf32>
    %103 = vector.broadcast %86 : vector<8x1xf32> to vector<8x256xf32>
    %104 = arith.addf %102, %103 : vector<8x256xf32>
    %c0_34 = arith.constant 0 : index
    %c0_35 = arith.constant 0 : index
    %105 = vector.load %arg2[%c0_34, %c0_35] : memref<8x4xbf16, #tpu.memory_space<vmem>>, vector<8x4xbf16>
    %cst_36 = arith.constant dense<0.000000e+00> : vector<8x256xf32>
    %106 = tpu.matmul %105, %0, %cst_36 {dimension_numbers = #tpu.dot_dimension_numbers<[1], [0], [0], [1], [0, 0, 1, 1], [], []>} : vector<8x4xbf16>, vector<4x256xbf16>, vector<8x256xf32> -> vector<8x256xf32>
    %c0_37 = arith.constant 0 : index
    %c0_38 = arith.constant 0 : index
    %107 = vector.load %arg3[%c0_37, %c0_38] : memref<8x1xf32, #tpu.memory_space<vmem>>, vector<8x1xf32>
    %108 = vector.broadcast %107 : vector<8x1xf32> to vector<8x256xf32>
    %109 = arith.addf %106, %108 : vector<8x256xf32>
    %110 = arith.addf %104, %109 : vector<8x256xf32>
    %c0_39 = arith.constant 0 : index
    %c0_40 = arith.constant 0 : index
    %111 = vector.load %arg8[%c0_39, %c0_40] : memref<8x256xf32, #tpu.memory_space<vmem>>, vector<8x256xf32>
    tpu.vector_store %arg8[%c0_39, %c0_40], %110 {strides = array<i32>} : memref<8x256xf32, #tpu.memory_space<vmem>>, vector<8x256xf32>,
    return
  }
  func.func @transform_0(%arg0: i32) -> (i32, i32) {
    %c0_i32 = arith.constant 0 : i32
    %c0_i32_0 = arith.constant 0 : i32
    return %c0_i32, %arg0 : i32, i32
  }
  func.func @transform_1(%arg0: i32) -> (i32, i32) {
    %c0_i32 = arith.constant 0 : i32
    %c0_i32_0 = arith.constant 0 : i32
    %c0_i32_1 = arith.constant 0 : i32
    return %c0_i32, %c0_i32_0 : i32, i32
  }
  func.func @transform_2(%arg0: i32) -> (i32, i32) {
    %c0_i32 = arith.constant 0 : i32
    %c0_i32_0 = arith.constant 0 : i32
    %c0_i32_1 = arith.constant 0 : i32
    return %c0_i32, %c0_i32_0 : i32, i32
  }
  func.func @transform_3(%arg0: i32) -> (i32, i32) {
    %c0_i32 = arith.constant 0 : i32
    %c0_i32_0 = arith.constant 0 : i32
    %c0_i32_1 = arith.constant 0 : i32
    return %c0_i32, %c0_i32_0 : i32, i32
  }
  func.func @transform_4(%arg0: i32) -> (i32, i32) {
    %c0_i32 = arith.constant 0 : i32
    %c0_i32_0 = arith.constant 0 : i32
    %c0_i32_1 = arith.constant 0 : i32
    return %c0_i32, %c0_i32_0 : i32, i32
  }
  func.func @transform_5(%arg0: i32) -> (i32, i32) {
    %c0_i32 = arith.constant 0 : i32
    %c0_i32_0 = arith.constant 0 : i32
    %c0_i32_1 = arith.constant 0 : i32
    return %c0_i32, %c0_i32_0 : i32, i32
  }
  func.func @transform_6(%arg0: i32) -> (i32, i32) {
    %c0_i32 = arith.constant 0 : i32
    %c0_i32_0 = arith.constant 0 : i32
    %c0_i32_1 = arith.constant 0 : i32
    return %c0_i32, %c0_i32_0 : i32, i32
  }
  func.func @transform_7(%arg0: i32) -> (i32, i32) {
    %c0_i32 = arith.constant 0 : i32
    %c0_i32_0 = arith.constant 0 : i32
    return %c0_i32, %arg0 : i32, i32
  }
}

</mosaic_0001>

<bundles_post_ra>
// kernel: tpu_custom_call.1
= control target key start
LH: loop header
LB: loop body
LE: loop exit
PB: predicated region body
PF: predicated region fallthrough
CT: control target
= control target key end

     0   :  { %12 = vsyncpa [#allocation3], 0  ;;  %s1105_s0 = inlined_call_operand.vmem [shape: bf16[4,512], index: 0, kind: input, shape index: {}]   ;;  %s1106_s1 = inlined_call_operand.vmem [shape: bf16[8,4], index: 1, kind: input, shape index: {}]   ;;  %s1107_s2 = inlined_call_operand.vmem [shape: f32[8,1], index: 2, kind: input, shape index: {}]   ;;  %s1108_s3 = inlined_call_operand.vmem [shape: bf16[24,4], index: 3, kind: input, shape index: {}]   ;;  %s1109_s4 = inlined_call_operand.vmem [shape: f32[8,1], index: 4, kind: input, shape index: {}]   ;;  %s1110_s5 = inlined_call_operand.vmem [shape: bf16[24,8], index: 5, kind: input, shape index: {}]   ;;  %s1111_s6 = inlined_call_operand.vmem [shape: f32[8,1], index: 6, kind: input, shape index: {}]   ;;  %s1112_s7 = inlined_call_operand.hbm [shape: f32[8,512], index: 7, kind: output, shape index: {}]  }
   0x1   :  { %14 = vsyncpa [#allocation3 + $0x1], 0  ;;  %s911_s24 = smov 0   ;;  %s913_s25 = smov 0  }
   0x2   :  { %s915_s26 = smov 0   ;;  %s917_s27 = smov 0  }
   0x3 LB: > { %s932_s28 = sadd.s32 4294967295, %s864_s27   ;;  %s722_s29 = sadd.s32 4294967294, %s864_s27   ;;  %s864_s27 = sphi %s917_s27, %s1118_s27   ;;  %s860_s26 = sphi %s915_s26, %s1117_s26   ;;  %s856_s25 = sphi %s913_s25, %s1116_s25   ;;  %s852_s24 = sphi %s911_s24, %s1115_s24  }
   0x4   : > { %s936_s30 = sadd.s32 1, %s864_s27   ;;  %s179_s8 = sadd.s32 1, %s860_s26 }
   0x5   : > { %s176_s9 = ssub.s32 %s864_s27, %s936_s30  ;;  %p189_p0 = scmp.ne.s32.totalorder %s860_s26, %s856_s25 }
   0x6   : > { %p177_p1 = scmp.eq.s32.totalorder %s176_s9, 0  ;;  %p190_p2 = scmp.eq.s32.totalorder %s932_s28, 1 }
   0x7   : > { %p195_p3 = scmp.ne.s32.totalorder %s856_s25, %s852_s24  ;;  %p196_p4 = scmp.eq.s32.totalorder %s722_s29, 1 }
   0x8   : > { %s947_s10 = scalar_select %p177_p1, %s860_s26, %s179_s8  }
   0x9   : > { %p949_p5 = por %p190_p2, %p189_p0  ;;  %p953_p6 = por %p196_p4, %p195_p3 }
   0xa   : > { %p725_p7 = scmp.ge.s32.totalorder %s864_s27, 1  ;;  %p241_p8 = scmp.lt.s32.totalorder %s864_s27, 3 }
   0xc   : > { %p242_p9 = pnand %p725_p7, %p241_p8 }
   0xd   : > { %s727_s13 = sshll.u32 (!%p242_p9), %s932_s28, 1  ;;  %v866_v0 = vmov (!%p242_p9), 0   ;;  %v343_v1 = vld [vmem:[%s1109_s4] sm:$0xff] (!%p242_p9)  ;;  %v282_v9 = vlaneseq (!%p242_p9)  ;;  %v867_v10 = vmov (!%p242_p9), 1983009808   ;;  %vm359_vm0 = vcmask (!%p242_p9), 1041408  }
   0xe   : > { %245 = sbr.rel (%p242_p9) target bundleno = 792 (0x318), region = 48  ;;  %p274_p10 = scmp.lt.s32.totalorder (!%p242_p9), %s727_s13, 3  ;;  %398 = vmatprep.mubr.bf16.mxu0 (!%p242_p9), %v866_v0  ;;  %790 = vset.pattern.permute.xlu0 (!%p242_p9), %v866_v0  ;;  %v587_v11 = vunpack.c.l.s4 (!%p242_p9), %v867_v10  ;;  %v792_v25 = vld [vmem:[%s1108_s3] sm:$0xff] (!%p242_p9)   ;;  %vm352_vm1 = vcmask (!%p242_p9), 31744   ;;  %v793_v27 = vld [vmem:[%s1108_s3 + $0x8] ss:$0 sps:$4 sm:$0xff] (!%p242_p9)  }
   0xf   : > { %532 = vmatprep.mubr.bf16.mxu1 (!%p242_p9), %v866_v0  ;;  %791 = vset.pattern.permute.xlu1 (!%p242_p9), %v866_v0  ;;  %v590_v13 = vshrl.u32 (!%p242_p9), %v282_v9, 7  ;;  %v578_v28 = vld [vmem:[%s1106_s1] sm:$0xf] (!%p242_p9)  ;;  %s868_s9 = smov (!%p242_p9), 2   ;;  %v995_v43 = vand.u32 (!%p242_p9), 127, %v282_v9  ;;  %vm493_vm8 = vcmask (!%p242_p9), 1043456  }
  0x10   : > { %449 = vperm.xlu0 (!%p242_p9), %790, %v343_v1   ;;  %v588_v12 = vunpack.c.0.s8 (!%p242_p9), %v587_v11  ;;  %v579_v37 = vld [vmem:[%s1107_s2] sm:$0xff] (!%p242_p9)  ;;  %vm486_vm9 = vcmask (!%p242_p9), 64512   ;;  %s270_s22 = sand.u32 (!%p242_p9), 1, %s856_s25   ;;  %s746_s29 = sshll.u32 (!%p242_p9), %s932_s28, 8 }
  0x11   : > { %v477_v42 = vld [vmem:[%s1111_s6] sm:$0xff] (!%p242_p9)  ;;  %v284_v44 = vadd.s32 (!%p242_p9), 128, %v995_v43  ;;  %v289_v46 = vand.u32 (!%p242_p9), 63, %v995_v43  ;;  %vm421_vm2 = vcmp.lt.s32.totalorder (!%p242_p9), %v995_v43, 2  ;;  %vm436_vm5 = vcmp.lt.s32.totalorder (!%p242_p9), %v995_v43, 126  ;;  %s726_s23 = sshll.u32 (!%p242_p9), %s270_s22, 4  ;;  %s1063_s15 = scalar_lea.hbm (!%p242_p9), %s1112_s7, %s746_s29 }
  0x12   : > { %v591_v15 = vsub.s32 (!%p242_p9), %v588_v12, %v590_v13  ;;  %s272_s8 = scalar_lea.vmem (!%p242_p9), [#allocation2], %s726_s23  ;;  %s649_s28 = scalar_lea.sflag (!%p242_p9), [#allocation3], %s270_s22 }
  0x13   : > { %v296_v47 = vand.u32 (!%p242_p9), 63, %v284_v44  ;;  %v999_v48 = vadd.s32 (!%p242_p9), 4294967294, %v289_v46  ;;  %v1010_v54 = vadd.s32 (!%p242_p9), 2, %v289_v46  ;;  %s870_s17 = smov (!%p242_p9), [#allocation2]  }
  0x14   : > { %s806_s18 = sshll.u32 (!%p242_p9), %s870_s17, 4  ;;  %s807_s18 = int_to_ptr.vmem [resolvable:$false] %s806_s18 }
  0x15   : > { %s1120_s13 = smov (!%p274_p10, %s727_s13), 3  ;;  %v1001_v49 = vadd.s32 4294967294, %v296_v47  ;;  %vm311_vm3 = vcmp.ge.s32.totalorder %v999_v48, 0  ;;  %v1012_v55 = vadd.s32 2, %v296_v47  ;;  %vm321_vm6 = vcmp.lt.s32.totalorder %v1010_v54, 64 }
  0x16   : > { %s728_s16 = sshll.u32 %s1120_s13, 1  ;;  %s869_s13 = smov 126  }
  0x17   : > { %s277_s19 = scalar_lea.vmem %s1105_s0, %s728_s16  ;;  %vm312_vm4 = vcmp.ge.s32.totalorder %v1001_v49, 0  ;;  %vm322_vm7 = vcmp.lt.s32.totalorder %v1012_v55, 64 }
  0x18   : > { %v281_v2 = vld [vmem:[%s277_s19] sm:$0xf]  ;;  %s808_s19 = scalar_lea.vmem %s807_s18, 512 }
  0x19   : > { %v328_v3 = vunpack.c.l.bf16 %v281_v2  ;;  %v592_v19 = vrot.slane %v281_v2, %v591_v15 }
  0x1b   : > { %v330_v4 = vmul.f32 %v328_v3, %v328_v3  ;;  %v329_v14 = vmul.f32 0.5, %v328_v3  ;;  %v593_v24 = vcombine.high %v592_v19, %v592_v19  ;;  %v598_v26 = vsel %vm359_vm0, %v592_v19, 0 }
  0x1d   : > { %v331_v5 = vmul.f32 %v330_v4, %v328_v3 }
  0x1f   : > { %v332_v6 = vmul.f32 0.044715, %v331_v5 }
  0x21   : > { %v333_v7 = vadd.f32 %v332_v6, %v328_v3 }
  0x23   : > { %v334_v8 = vmul.f32 0.7978846, %v333_v7 }
  0x25   : > { %796 = vtanh.f32 %v334_v8 }
  0x2f   : > { %v797_v16 = vpop.eup %796 }
  0x30   : > { %v336_v17 = vadd.f32 1.0, %v797_v16 }
  0x32   : > { %v337_v18 = vmul.f32 %v336_v17, %v329_v14 }
  0x34   : > { %v339_v20 = vcombine.high %v337_v18, %v337_v18  ;;  %v341_v21 = vpack.c.bf16 %v337_v18, %v337_v18 }
  0x36   : > { %v342_v22 = vpack.c.bf16 %v339_v20, %v339_v20  ;;  %v361_v23 = vsel %vm359_vm0, %v341_v21, 0 }
  0x38   : > { %731 = vmatprep.subr.msk.bf16.mxu0 %vm359_vm0, %v342_v22 }
  0x39   : > { %367 = vmatpush1.bf16.msra.mxu0 %v361_v23 }
  0x3a   : > { %739 = vmatprep.subr.msk.bf16.mxu0 %vm359_vm0, %v593_v24 }
  0x3c   : > { %732 = vmatmul.mubr.msk.bf16.vlgmr.msra.gmra.mrb[0].mxu0 %vm352_vm1, %v792_v25 }
  0x3d   : > { %408 = vmatprep.mubr.bf16.mxu0 %v866_v0  ;;  %604 = vmatpush1.bf16.msra.mxu0 %v598_v26 }
  0x44   : > { %733 = vmatmul.mubr.msk.bf16.gmra.mrb[4].mxu0 %vm352_vm1, %v793_v27 }
  0x45   : > { %635 = vmatprep.mubr.bf16.mxu0 %v866_v0 }
  0x4c   : > { %740 = vmatmul.mubr.msk.bf16.vlgmr.msra.gmra.mrb[8].mxu0 %vm352_vm1, %v578_v28  ;;  %v794_v28 = vld [vmem:[%s1110_s5] sm:$0xff]  }
  0x8f   : > { %v450_v45 = vpop.permute.xlu0 %449 }
 0x10f   : > { %v400_v29 = vpop.f32.mrb[0].mxu0 }
 0x110   : > { %417 = vrot.lane.b32.xlu0 %v400_v29, %s868_s9  ;;  %v402_v30 = vpop.f32.mrb[1].mxu0  ;;  %v795_v29 = vld [vmem:[%s1110_s5 + $0x8] ss:$0 sps:$4 sm:$0xff]  }
 0x111   : > { %419 = vrot.lane.b32.xlu1 %v402_v30, %s868_s9  ;;  %v404_v31 = vpop.f32.mrb[2].mxu0 }
 0x112   : > { %v406_v32 = vpop.f32.mrb[3].mxu0 }
 0x117   : > { %v410_v33 = vpop.f32.mrb[4].mxu0 }
 0x118   : > { %432 = vrot.lane.b32.xlu1 %v410_v33, %s869_s13  ;;  %v412_v34 = vpop.f32.mrb[5].mxu0 }
 0x119   : > { %434 = vrot.lane.b32.xlu0 %v412_v34, %s869_s13  ;;  %v414_v35 = vpop.f32.mrb[6].mxu0 }
 0x11a   : > { %v415_v36 = vpop.f32.mrb[7].mxu0 }
 0x11c   : > { %573 = vperm.xlu1 %791, %v477_v42  }
 0x11d   : > { %582 = vperm.xlu0 %790, %v579_v37  }
 0x11f   : > { %v988_v38 = vpop.f32.mrb[8].mxu0 }
 0x120   : > { %v990_v39 = vpop.f32.mrb[9].mxu0 }
 0x121   : > { %v641_v40 = vpop.f32.mrb[10].mxu0 }
 0x122   : > { %v642_v41 = vpop.f32.mrb[11].mxu0 }
 0x182   : > { %v418_v50 = vpop.permute.xlu0 %417 }
 0x183   : > { %v420_v51 = vpop.permute.xlu1 %419 }
 0x184   : > { %v422_v52 = vsel %vm421_vm2, %v418_v50, %v420_v51  ;;  %v423_v53 = vsel %vm421_vm2, %v420_v51, %v418_v50 }
 0x185   : > { %v428_v56 = vsel %vm311_vm3, %v423_v53, 0.0  ;;  %v429_v57 = vsel %vm312_vm4, %v422_v52, 0.0 }
 0x186   : > { %v430_v60 = vadd.f32 %v428_v56, %v404_v31  ;;  %v431_v61 = vadd.f32 %v429_v57, %v406_v32 }
 0x18a   : > { %v433_v58 = vpop.permute.xlu1 %432 }
 0x18b   : > { %v435_v59 = vpop.permute.xlu0 %434 }
 0x18c   : > { %v437_v62 = vsel %vm436_vm5, %v433_v58, %v435_v59  ;;  %v438_v63 = vsel %vm436_vm5, %v435_v59, %v433_v58 }
 0x18d   : > { %v443_v1 = vsel %vm321_vm6, %v437_v62, 0.0  ;;  %v444_v2 = vsel %vm322_vm7, %v438_v63, 0.0 }
 0x18e   : > { %v445_v3 = vadd.f32 %v443_v1, %v430_v60  ;;  %v446_v4 = vadd.f32 %v444_v2, %v431_v61 }
 0x190   : > { %v452_v5 = vadd.f32 %v450_v45, %v445_v3  ;;  %v453_v6 = vadd.f32 %v450_v45, %v446_v4 }
 0x192   : > { %v460_v7 = vmul.f32 %v453_v6, %v453_v6  ;;  %v459_v8 = vmul.f32 %v452_v5, %v452_v5  ;;  %v458_v19 = vmul.f32 0.5, %v453_v6  ;;  %v457_v21 = vmul.f32 0.5, %v452_v5 }
 0x194   : > { %v462_v9 = vmul.f32 %v460_v7, %v453_v6  ;;  %v461_v10 = vmul.f32 %v459_v8, %v452_v5 }
 0x196   : > { %v464_v11 = vmul.f32 0.044715, %v462_v9  ;;  %v463_v12 = vmul.f32 0.044715, %v461_v10 }
 0x198   : > { %v466_v13 = vadd.f32 %v464_v11, %v453_v6  ;;  %v465_v14 = vadd.f32 %v463_v12, %v452_v5 }
 0x19a   : > { %v468_v15 = vmul.f32 0.7978846, %v466_v13  ;;  %v467_v16 = vmul.f32 0.7978846, %v465_v14 }
 0x19b   : > { %v574_v37 = vpop.permute.xlu1 %573 }
 0x19c   : > { %798 = vtanh.f32 %v468_v15  ;;  %v583_v40 = vpop.permute.xlu0 %582 }
 0x19d   : > { %800 = vtanh.f32 %v467_v16  ;;  %v638_v60 = vadd.f32 %v988_v38, %v583_v40  ;;  %v640_v61 = vadd.f32 %v990_v39, %v583_v40 }
 0x1a6   : > { %v799_v17 = vpop.eup %798 }
 0x1a7   : > { %v801_v18 = vpop.eup %800  ;;  %v472_v20 = vadd.f32 1.0, %v799_v17 }
 0x1a8   : > { %v471_v22 = vadd.f32 1.0, %v801_v18 }
 0x1a9   : > { %v474_v23 = vmul.f32 %v472_v20, %v458_v19 }
 0x1aa   : > { %v473_v24 = vmul.f32 %v471_v22, %v457_v21 }
 0x1ab   : > { %v476_v25 = vpack.c.bf16 %v474_v23, %v474_v23 }
 0x1ac   : > { %v475_v26 = vpack.c.bf16 %v473_v24, %v473_v24 }
 0x1ad   : > { %736 = vmatprep.subr.msk.bf16.mxu1 %vm493_vm8, %v476_v25 }
 0x1ae   : > { %v495_v27 = vsel %vm493_vm8, %v475_v26, 0 }
 0x1af   : > { %501 = vmatpush1.bf16.msra.mxu1 %v495_v27 }
 0x1b2   : > { %737 = vmatmul.mubr.msk.bf16.vlgmr.msra.gmra.mrb[0].mxu1 %vm486_vm9, %v794_v28 }
 0x1b3   : > { %542 = vmatprep.mubr.bf16.mxu1 %v866_v0 }
 0x1ba   : > { %738 = vmatmul.mubr.msk.bf16.gmra.mrb[4].mxu1 %vm486_vm9, %v795_v29 }
 0x285   : > { %v534_v30 = vpop.f32.mrb[0].mxu1 }
 0x286   : > { %551 = vrot.lane.b32.xlu1 %v534_v30, %s868_s9  ;;  %v536_v31 = vpop.f32.mrb[1].mxu1 }
 0x287   : > { %553 = vrot.lane.b32.xlu0 %v536_v31, %s868_s9  ;;  %v538_v32 = vpop.f32.mrb[2].mxu1  ;;  %s663_s9 = sshll.u32 %s272_s8, 4  ;;  %s1065_s9 = int_to_ptr.vmem [resolvable:$true] %s663_s9 }
 0x288   : > { %v540_v33 = vpop.f32.mrb[3].mxu1  ;;  %s802_s16 = scalar_lea.vmem %s1065_s9, 256  ;;  %p809_p0 = scmp.lt.s32.totalorder %s1065_s9, %s807_s18 }
 0x289   : > { %p803_p11 = scmp.ne.s32.totalorder %s1065_s9, %s802_s16  ;;  %p810_p1 = scmp.lt.s32.totalorder %s808_s19, %s802_s16 }
 0x28b   : > { %p804_p12 = pnand %p803_p11, %p949_p5  ;;  %p811_p2 = por %p810_p1, %p809_p0 }
 0x28d   : > { %v544_v34 = vpop.f32.mrb[4].mxu1  ;;  %p805_p13 = pneg %p804_p12 }
 0x28e   : > { %561 = vrot.lane.b32.xlu1 %v544_v34, %s869_s13  ;;  %v546_v35 = vpop.f32.mrb[5].mxu1 }
 0x28f   : > { %563 = vrot.lane.b32.xlu0 %v546_v35, %s869_s13  ;;  %v548_v0 = vpop.f32.mrb[6].mxu1  ;;  %p812_p3 = pnand %p811_p2, %p805_p13 }
 0x290   : > { %v549_v36 = vpop.f32.mrb[7].mxu1 }
 0x2f8   : > { %v552_v41 = vpop.permute.xlu1 %551 }
 0x2f9   : > { %v554_v42 = vpop.permute.xlu0 %553 }
 0x2fa   : > { %v555_v44 = vsel %vm421_vm2, %v552_v41, %v554_v42  ;;  %v556_v45 = vsel %vm421_vm2, %v554_v42, %v552_v41 }
 0x2fb   : > { %v557_v46 = vsel %vm311_vm3, %v556_v45, 0.0  ;;  %v558_v47 = vsel %vm312_vm4, %v555_v44, 0.0 }
 0x2fc   : > { %v559_v52 = vadd.f32 %v557_v46, %v538_v32  ;;  %v560_v53 = vadd.f32 %v558_v47, %v540_v33 }
 0x300   : > { %v562_v50 = vpop.permute.xlu1 %561 }
 0x301   : > { %v564_v51 = vpop.permute.xlu0 %563 }
 0x302   : > { %v565_v56 = vsel %vm436_vm5, %v562_v50, %v564_v51  ;;  %v566_v57 = vsel %vm436_vm5, %v564_v51, %v562_v50 }
 0x303   : > { %v567_v58 = vsel %vm321_vm6, %v565_v56, 0.0  ;;  %v568_v48 = vsel %vm322_vm7, %v566_v57, 0.0 }
 0x304   : > { %v569_v59 = vadd.f32 %v567_v58, %v559_v52  ;;  %v570_v49 = vadd.f32 %v568_v48, %v560_v53 }
 0x306   : > { %v576_v62 = vadd.f32 %v574_v37, %v569_v59  ;;  %v577_v63 = vadd.f32 %v574_v37, %v570_v49 }
 0x308   : > { %v644_v43 = vadd.f32 %v638_v60, %v576_v62  ;;  %v645_v1 = vadd.f32 %v640_v61, %v577_v63 }
 0x30a   : > { %646 = vst [vmem:[%s272_s8] sm:$0xff] %v644_v43  ;;  %647 = vst [vmem:[%s272_s8 + $0x8] sm:$0xff] %v645_v1 }
 0x30b   : > { %815 = shalt.err (!%p812_p3)
}
 0x30c   : > { %s816_s20 = scalar_lea.hbm %s1063_s15, 256  ;;  %s820_s23 = scalar_lea.hbm %s1112_s7, 512 }
 0x30d   : > { %p817_p4 = scmp.ne.s32.totalorder %s1063_s15, %s816_s20  ;;  %p821_p9 = scmp.lt.u32.totalorder %s1063_s15, %s1112_s7 }
 0x30e   : > { %p822_p10 = scmp.lt.u32.totalorder %s820_s23, %s816_s20  ;;  %p824_p12 = scmp.lt.u32.totalorder %s816_s20, %s1063_s15 }
 0x30f   : > { %p818_p7 = pnand %p817_p4, %p949_p5 }
 0x310   : > { %p823_p11 = por %p822_p10, %p821_p9 }
 0x311   : > { %p819_p8 = pneg %p818_p7 }
 0x312   : > { %p825_p13 = por %p824_p12, %p823_p11 }
 0x314   : > { %p826_p0 = pnand %p825_p13, %p819_p8 }
 0x316   : > { %829 = shalt.err (!%p826_p0)
}
 0x317   : > { %747 = dma.vmem_to_hbm [thread:$0]  (%p949_p5), %s1065_s9, 256, %s1063_s15, %s649_s28  }
 0x318 PF: > { %p753_p1 = scmp.ge.s32.totalorder %s864_s27, 2  ;;  %s675_s13 = sand.u32 1, %s852_s24  }
 0x319   : > { %s676_s14 = scalar_lea.sflag [#allocation3], %s675_s13 }
 0x31a   : > { %p750_p2 = pnand %p753_p1, %p953_p6 }
 0x31c   : > { %847 = dma.done.wait (!%p750_p2), %s676_s14, 256  }
 0x31d   : > { %849 = vsyncadd (!%p750_p2), %s676_s14, 4294967040  ;;  %p17_p3 = scmp.ge.s32.totalorder %s936_s30, 4   ;;  %s1115_s24 = smov %s856_s25 }
 0x31e   : > { %s1116_s25 = smov %s860_s26  ;;  %s1117_s26 = smov %s947_s10 }
 0x31f   : > { %s1118_s27 = smov %s936_s30  ;;  %19 = sbr.rel (!%p17_p3) target bundleno = 3 (0x3), region = 83 }
 0x326   :  { %681 = vsyncpa [#allocation3], 1 }
 0x327   :  { %683 = vsyncpa [#allocation3 + $0x1], 1 }

</bundles_post_ra>
